<compile_context>
chip_gen: v5e
topology: v5e:2x2
jax: 0.10.0
libtpu: 0.0.40
codegen_flags: <defaults>
</compile_context>

<pallas_src>
import numpy as np
import jax
import jax.numpy as jnp
from jax.experimental import pallas as pl
from jax.experimental.pallas import tpu as pltpu

# ---------------- NGP config (mirrors the PyTorch __init__) ----------------
L = 16                    # n_levels
F_PER_LEVEL = 2           # n_features_per_level
LOG2_T = 19
T = 1 << LOG2_T           # hashmap size per level
N_MIN = 16                # base_resolution
CENTER = 0.0
SCALE = 2.0
FEATURES = 32             # "features" ctor arg
ENC_DIM = L * F_PER_LEVEL          # 32  (encoder output dim)
HIDDEN = 64                        # n_neurons
OUT_DIM = 3 * FEATURES             # 96  (n_output_dims)
B_GROWTH = float(np.exp(np.log(2048 * SCALE / N_MIN) / (L - 1)))  # per_level_scale

_PRIMES = (1, 2654435761, 805459861)          # instant-ngp spatial hash primes
_CORNER_OFFSETS = np.array(
    [[(c >> d) & 1 for d in range(3)] for c in range(8)], dtype=np.int32)  # (8,3)

# Static per-level constants (resolution, dense-vs-hashed, flat-table offset).
_LEVEL_RES = np.array(
    [int(np.ceil(N_MIN * B_GROWTH ** l)) + 1 for l in range(L)], dtype=np.int32)
_LEVEL_DENSE = (_LEVEL_RES.astype(np.int64) ** 3) <= T                    # (L,) bool
_LEVEL_OFFSET = (np.arange(L, dtype=np.int64) * T).astype(np.int32)       # (L,)


def _round_up(n, m):
    return ((n + m - 1) // m) * m


# --------------------------- Pallas kernel ---------------------------------
def ngp_mlp_kernel(enc_ref, w1_ref, w2_ref, out_ref):
    # enc_ref : (TN, 32)   trilinearly-interpolated hash-grid features
    # w1_ref  : (32, 64)   hidden layer weights
    # w2_ref  : (64, 96)   output layer weights
    # out_ref : (TN, 96)
    # FullyFusedMLP: ReLU hidden, ReLU output (no bias in tcnn FullyFusedMLP);
    # the hidden activation h never touches HBM.
    h = jnp.maximum(
        jnp.dot(enc_ref[...], w1_ref[...], preferred_element_type=jnp.float32),
        0.0)
    out_ref[...] = jnp.maximum(
        jnp.dot(h, w2_ref[...], preferred_element_type=jnp.float32), 0.0)


def ngp_mlp_pallas(enc, W1, W2, tile_n=1024):
    """enc:(N,32) f32 -> (N,96) f32 via the fused two-layer MLP."""
    N = enc.shape[0]
    # Clamp the tile to the (128-rounded) batch so tiny batches still work,
    # while large batches use big tiles (amortize per-grid-step overhead).
    n128 = _round_up(max(N, 1), 128)
    tile_n = min(tile_n, n128)
    # If the whole batch is a single tile, split it in two so the "parallel"
    # grid axis has >=2 steps and both TensorCores (v7x megacore) get work.
    if tile_n == n128 and tile_n >= 256 and tile_n % 256 == 0:
        tile_n //= 2
    n_pad = _round_up(N, tile_n)
    if n_pad != N:
        enc = jnp.pad(enc, ((0, n_pad - N), (0, 0)))
    grid = (n_pad // tile_n,)

    out = pl.pallas_call(
        ngp_mlp_kernel,
        out_shape=jax.ShapeDtypeStruct((n_pad, OUT_DIM), jnp.float32),
        grid_spec=pltpu.PrefetchScalarGridSpec(
            num_scalar_prefetch=0,
            grid=grid,
            in_specs=[
                pl.BlockSpec((tile_n, ENC_DIM), lambda i: (i, 0)),
                pl.BlockSpec((ENC_DIM, HIDDEN), lambda i: (0, 0)),
                pl.BlockSpec((HIDDEN, OUT_DIM), lambda i: (0, 0)),
            ],
            out_specs=pl.BlockSpec((tile_n, OUT_DIM), lambda i: (i, 0)),
        ),
        compiler_params=pltpu.CompilerParams(
            dimension_semantics=("parallel",),
            vmem_limit_bytes=32 * 1024 * 1024),
    )(enc, W1, W2)

    if n_pad != N:
        out = out[:N]
    return out


# ------------------ hash-grid encoding (JAX glue, fuses in XLA) -------------
def hash_encoding_encode(x01, grid_params):
    """x01:(N,3) in [0,1]; grid_params:(L, T, F). Returns enc:(N, L*F) f32.

    Fully vectorized over levels: all L*8 corner indices are computed at once
    and resolved with a single fused jnp.take over the flattened (L*T, F)
    table, then trilinearly interpolated.  Kept in XLA so the gathered corner
    features fuse into the reduction and only 128 B/point reach the Pallas
    kernel."""
    # TODO(synk): exact bit-for-bit tcnn hash/resolution conventions are not
    # reproducible without the CUDA source; this is the standard instant-ngp scheme.
    N = x01.shape[0]
    offs = jnp.asarray(_CORNER_OFFSETS)                           # (8,3)
    res_f = jnp.asarray(_LEVEL_RES, jnp.float32)[None, :, None]   # (1,L,1)
    res_i = jnp.asarray(_LEVEL_RES, jnp.int32)[None, :, None, None]  # (1,L,1,1)

    pos = x01[:, None, :] * (res_f - 1.0)                         # (N,L,3)
    p0 = jnp.clip(jnp.floor(pos), 0.0, res_f - 2.0)               # (N,L,3)
    frac = pos - p0                                                # (N,L,3)
    p0 = p0.astype(jnp.int32)

    corners = p0[:, :, None, :] + offs[None, None, :, :]           # (N,L,8,3)
    w = jnp.where(offs[None, None, :, :] == 1,
                  frac[:, :, None, :], 1.0 - frac[:, :, None, :])
    w = jnp.prod(w, axis=-1)                                       # (N,L,8)

    # Dense index for coarse levels (R^3 <= T); spatial hash for fine levels.
    r = res_i[..., 0]                                              # (1,L,1)
    dense_idx = (corners[..., 0]
                 + corners[..., 1] * r
                 + corners[..., 2] * (r * r))                      # (N,L,8)
    cu = corners.astype(jnp.uint32)
    h = cu[..., 0] * jnp.uint32(_PRIMES[0])
    h = jnp.bitwise_xor(h, cu[..., 1] * jnp.uint32(_PRIMES[1]))
    h = jnp.bitwise_xor(h, cu[..., 2] * jnp.uint32(_PRIMES[2]))
    hash_idx = (h & jnp.uint32(T - 1)).astype(jnp.int32)           # (N,L,8)

    dense_mask = jnp.asarray(_LEVEL_DENSE)[None, :, None]          # (1,L,1)
    idx = jnp.where(dense_mask, dense_idx, hash_idx)               # (N,L,8)
    flat_idx = idx + jnp.asarray(_LEVEL_OFFSET)[None, :, None]     # (N,L,8)

    table = grid_params.reshape(L * T, F_PER_LEVEL)                # no-op reshape
    g = jnp.take(table, flat_idx, axis=0)                          # (N,L,8,F)
    enc = jnp.sum(g * w[..., None], axis=2)                        # (N,L,F)
    return enc.reshape(N, ENC_DIM)                                 # (N,32)


def ngp_forward(x, grid_params, W1, W2):
    # matches NGP.forward: normalize, clamp to [0,1], encode + MLP, float32 out
    x01 = jnp.clip((x - CENTER) / SCALE + 0.5, 0.0, 1.0)
    enc = hash_encoding_encode(x01, grid_params)
    return ngp_mlp_pallas(enc, W1, W2)


ngp_forward_jit = jax.jit(ngp_forward)


# --------------------------------- main -------------------------------------
if __name__ == "__main__":
    key = jax.random.PRNGKey(0)
    k_x, k_grid, k_w1, k_w2 = jax.random.split(key, 4)

    N = 128
    x = jax.random.uniform(k_x, (N, 3), jnp.float32, minval=-2.0, maxval=2.0)

    # deterministic synthetic parameters (tcnn grid init ~ U(-1e-4, 1e-4))
    grid_params = jax.random.uniform(
        k_grid, (L, T, F_PER_LEVEL), jnp.float32, minval=-1e-4, maxval=1e-4)
    W1 = jax.random.normal(k_w1, (ENC_DIM, HIDDEN), jnp.float32) / np.sqrt(ENC_DIM)
    W2 = jax.random.normal(k_w2, (HIDDEN, OUT_DIM), jnp.float32) / np.sqrt(HIDDEN)

    feat = ngp_forward_jit(x, grid_params, W1, W2)
    feat = jax.block_until_ready(feat)
    assert feat.shape == (N, OUT_DIM) and feat.dtype == jnp.float32

    # pure-JAX reference for the in-kernel math (MLP on the same encoding)
    x01 = jnp.clip((x - CENTER) / SCALE + 0.5, 0.0, 1.0)
    enc_ref = hash_encoding_encode(x01, grid_params)
    ref = jnp.maximum(jnp.maximum(enc_ref @ W1, 0.0) @ W2, 0.0)
    if not jnp.allclose(feat, ref, atol=1e-4, rtol=1e-4):
        raise AssertionError("Pallas kernel output mismatch vs JAX reference")

    print("KERNEL_OK")
</pallas_src>

<mosaic_0001>
module attributes {stable_mosaic.version = 11 : i64} {
  func.func @ngp_mlp_kernel(%arg0: i32, %arg1: memref<128x32xf32, #tpu.memory_space<vmem>>, %arg2: memref<32x64xf32, #tpu.memory_space<vmem>>, %arg3: memref<64x96xf32, #tpu.memory_space<vmem>>, %arg4: memref<128x96xf32, #tpu.memory_space<vmem>>) attributes {dimension_semantics = [#tpu.dimension_semantics<parallel>], iteration_bounds = array<i64: 1>, scalar_prefetch = 0 : i64, scratch_operands = 0 : i64, tpu.core_type = #tpu.core_type<tc>, window_params = [{transform_indices = @transform_0, window_bounds = array<i64: 128, 32>}, {pipeline_mode = #tpu.pipeline_mode<synchronous>, transform_indices = @transform_1, window_bounds = array<i64: 32, 64>}, {pipeline_mode = #tpu.pipeline_mode<synchronous>, transform_indices = @transform_2, window_bounds = array<i64: 64, 96>}, {transform_indices = @transform_3, window_bounds = array<i64: 128, 96>}]} {
    %c0 = arith.constant 0 : index
    %c0_0 = arith.constant 0 : index
    %0 = vector.load %arg1[%c0, %c0_0] : memref<128x32xf32, #tpu.memory_space<vmem>>, vector<128x32xf32>
    %c0_1 = arith.constant 0 : index
    %c0_2 = arith.constant 0 : index
    %1 = vector.load %arg2[%c0_1, %c0_2] : memref<32x64xf32, #tpu.memory_space<vmem>>, vector<32x64xf32>
    %cst = arith.constant dense<0.000000e+00> : vector<128x64xf32>
    %2 = tpu.matmul %0, %1, %cst {dimension_numbers = #tpu.dot_dimension_numbers<[1], [0], [0], [1], [0, 0, 1, 1], [], []>} : vector<128x32xf32>, vector<32x64xf32>, vector<128x64xf32> -> vector<128x64xf32>
    %cst_3 = arith.constant 0.000000e+00 : f32
    %3 = vector.broadcast %cst_3 : f32 to vector<128x64xf32>
    %4 = arith.maximumf %2, %3 : vector<128x64xf32>
    %c0_4 = arith.constant 0 : index
    %c0_5 = arith.constant 0 : index
    %5 = vector.load %arg3[%c0_4, %c0_5] : memref<64x96xf32, #tpu.memory_space<vmem>>, vector<64x96xf32>
    %cst_6 = arith.constant dense<0.000000e+00> : vector<128x96xf32>
    %6 = tpu.matmul %4, %5, %cst_6 {dimension_numbers = #tpu.dot_dimension_numbers<[1], [0], [0], [1], [0, 0, 1, 1], [], []>} : vector<128x64xf32>, vector<64x96xf32>, vector<128x96xf32> -> vector<128x96xf32>
    %cst_7 = arith.constant 0.000000e+00 : f32
    %7 = vector.broadcast %cst_7 : f32 to vector<128x96xf32>
    %8 = arith.maximumf %6, %7 : vector<128x96xf32>
    %c0_8 = arith.constant 0 : index
    %c0_9 = arith.constant 0 : index
    %9 = vector.load %arg4[%c0_8, %c0_9] : memref<128x96xf32, #tpu.memory_space<vmem>>, vector<128x96xf32>
    tpu.vector_store %arg4[%c0_8, %c0_9], %8 {strides = array<i32>} : memref<128x96xf32, #tpu.memory_space<vmem>>, vector<128x96xf32>,
    return
  }
  func.func @transform_0(%arg0: i32) -> (i32, i32) {
    %c0_i32 = arith.constant 0 : i32
    %c0_i32_0 = arith.constant 0 : i32
    return %arg0, %c0_i32 : i32, i32
  }
  func.func @transform_1(%arg0: i32) -> (i32, i32) {
    %c0_i32 = arith.constant 0 : i32
    %c0_i32_0 = arith.constant 0 : i32
    %c0_i32_1 = arith.constant 0 : i32
    return %c0_i32, %c0_i32_0 : i32, i32
  }
  func.func @transform_2(%arg0: i32) -> (i32, i32) {
    %c0_i32 = arith.constant 0 : i32
    %c0_i32_0 = arith.constant 0 : i32
    %c0_i32_1 = arith.constant 0 : i32
    return %c0_i32, %c0_i32_0 : i32, i32
  }
  func.func @transform_3(%arg0: i32) -> (i32, i32) {
    %c0_i32 = arith.constant 0 : i32
    %c0_i32_0 = arith.constant 0 : i32
    return %arg0, %c0_i32 : i32, i32
  }
}

</mosaic_0001>

<bundles_post_ra>
// kernel: ngp_forward.1
= control target key start
LH: loop header
LB: loop body
LE: loop exit
PB: predicated region body
PF: predicated region fallthrough
CT: control target
= control target key end

     0   :  { %vm34_vm0 = vcmask 261120   ;;  %vm172_vm1 = vcmask 523264   ;;  %vm302_vm2 = vcmask 785408   ;;  %s567_s1 = inlined_call_operand.vmem [shape: f32[32,64], index: 1, kind: input, shape index: {}]   ;;  %s568_s0 = inlined_call_operand.vmem [shape: f32[128,32], index: 0, kind: input, shape index: {}]   ;;  %s569_s2 = inlined_call_operand.vmem [shape: f32[64,96], index: 2, kind: input, shape index: {}]   ;;  %s570_s3 = inlined_call_operand.vmem [shape: f32[128,96], index: 3, kind: output, shape index: {}]  }
   0x1   :  { %v33_v0 = vld [vmem:[%s567_s1 + $0x18] sm:$0xff]  ;;  %v32_v1 = vld [vmem:[%s567_s1 + $0x10] sm:$0xff]  ;;  %v31_v2 = vld [vmem:[%s567_s1 + $0x8] sm:$0xff] }
   0x2   :  { %95 = vmatpush.msra.mxu0 %v33_v0  ;;  %355 = vmatpush.msra.mxu3 %v33_v0  ;;  %v30_v3 = vld [vmem:[%s567_s1] sm:$0xff]  ;;  %v15_v5 = vld [vmem:[%s568_s0 + $0x8] sm:$0xff]  ;;  %v16_v6 = vld [vmem:[%s568_s0 + $0x10] sm:$0xff] }
   0x3   :  { %v14_v4 = vld [vmem:[%s568_s0] sm:$0xff]  ;;  %v17_v7 = vld [vmem:[%s568_s0 + $0x18] sm:$0xff]  ;;  %v23_v9 = vld [vmem:[%s568_s0 + $0x48] sm:$0xff] }
   0x4   :  { %96 = vmatpush.msra.mxu0 %v32_v1  ;;  %356 = vmatpush.msra.mxu3 %v32_v1  ;;  %v18_v8 = vld [vmem:[%s568_s0 + $0x20] sm:$0xff]  ;;  %v19_v10 = vld [vmem:[%s568_s0 + $0x28] sm:$0xff]  ;;  %v24_v11 = vld [vmem:[%s568_s0 + $0x50] sm:$0xff] }
   0x5   :  { %v171_v12 = vld [vmem:[%s569_s2 + $0x38] sm:$0xff]  ;;  %v20_v13 = vld [vmem:[%s568_s0 + $0x30] sm:$0xff]  ;;  %v169_v16 = vld [vmem:[%s569_s2 + $0x28] sm:$0xff] }
   0x6   :  { %97 = vmatpush.msra.mxu0 %v31_v2  ;;  %357 = vmatpush.msra.mxu3 %v31_v2  ;;  %v25_v14 = vld [vmem:[%s568_s0 + $0x58] sm:$0xff]  ;;  %v170_v15 = vld [vmem:[%s569_s2 + $0x30] sm:$0xff]  ;;  %v168_v17 = vld [vmem:[%s569_s2 + $0x20] sm:$0xff] }
   0x7   :  { %229 = vmatpush.msra.mxu1 %v171_v12  ;;  %359 = vmatpush.msra.mxu2 %v171_v12  ;;  %v21_v18 = vld [vmem:[%s568_s0 + $0x38] sm:$0xff]  ;;  %v26_v20 = vld [vmem:[%s568_s0 + $0x60] sm:$0xff]  ;;  %v166_v21 = vld [vmem:[%s569_s2 + $0x10] sm:$0xff] }
   0x8   :  { %98 = vmatpush.msra.mxu0 %v30_v3  ;;  %358 = vmatpush.msra.mxu3 %v30_v3  ;;  %v167_v19 = vld [vmem:[%s569_s2 + $0x18] sm:$0xff]  ;;  %v22_v22 = vld [vmem:[%s568_s0 + $0x40] sm:$0xff]  ;;  %v27_v23 = vld [vmem:[%s568_s0 + $0x68] sm:$0xff] }
   0x9   :  { %323 = vmatmul.msk.f32.vlgmr.msra.gmra.mxu0 %vm34_vm0, %v14_v4  ;;  %332 = vmatmul.msk.f32.vlgmr.msra.gmra.mxu3 %vm34_vm0, %v23_v9  ;;  %v28_v24 = vld [vmem:[%s568_s0 + $0x70] sm:$0xff]  ;;  %v29_v25 = vld [vmem:[%s568_s0 + $0x78] sm:$0xff]  ;;  %v165_v26 = vld [vmem:[%s569_s2 + $0x8] sm:$0xff] }
   0xa   :  { %230 = vmatpush.msra.mxu1 %v170_v15  ;;  %360 = vmatpush.msra.mxu2 %v170_v15  ;;  %v164_v27 = vld [vmem:[%s569_s2] sm:$0xff] }
   0xc   :  { %231 = vmatpush.msra.mxu1 %v169_v16  ;;  %361 = vmatpush.msra.mxu2 %v169_v16 }
   0xe   :  { %232 = vmatpush.msra.mxu1 %v168_v17  ;;  %362 = vmatpush.msra.mxu2 %v168_v17 }
  0x10   :  { %233 = vmatpush.msra.mxu1 %v167_v19  ;;  %363 = vmatpush.msra.mxu2 %v167_v19 }
  0x11   :  { %324 = vmatmul.msk.f32.gmra.mxu0 %vm34_vm0, %v15_v5  ;;  %333 = vmatmul.msk.f32.gmra.mxu3 %vm34_vm0, %v24_v11 }
  0x12   :  { %234 = vmatpush.msra.mxu1 %v166_v21  ;;  %364 = vmatpush.msra.mxu2 %v166_v21 }
  0x14   :  { %235 = vmatpush.msra.mxu1 %v165_v26  ;;  %365 = vmatpush.msra.mxu2 %v165_v26 }
  0x16   :  { %236 = vmatpush.msra.mxu1 %v164_v27  ;;  %366 = vmatpush.msra.mxu2 %v164_v27 }
  0x19   :  { %325 = vmatmul.msk.f32.gmra.mxu0 %vm34_vm0, %v16_v6  ;;  %334 = vmatmul.msk.f32.gmra.mxu3 %vm34_vm0, %v25_v14 }
  0x21   :  { %326 = vmatmul.msk.f32.gmra.mxu0 %vm34_vm0, %v17_v7  ;;  %335 = vmatmul.msk.f32.gmra.mxu3 %vm34_vm0, %v26_v20 }
  0x29   :  { %327 = vmatmul.msk.f32.gmra.mxu0 %vm34_vm0, %v18_v8  ;;  %336 = vmatmul.msk.f32.gmra.mxu3 %vm34_vm0, %v27_v23 }
  0x31   :  { %328 = vmatmul.msk.f32.gmra.mxu0 %vm34_vm0, %v19_v10  ;;  %337 = vmatmul.msk.f32.gmra.mxu3 %vm34_vm0, %v28_v24 }
  0x39   :  { %329 = vmatmul.msk.f32.gmra.mxu0 %vm34_vm0, %v20_v13  ;;  %338 = vmatmul.msk.f32.gmra.mxu3 %vm34_vm0, %v29_v25 }
  0x41   :  { %330 = vmatmul.msk.f32.gmra.mxu0 %vm34_vm0, %v21_v18 }
  0x49   :  { %331 = vmatmul.msk.f32.gmra.mxu0 %vm34_vm0, %v22_v22 }
  0x86   :  { %v100_v28 = vpop.f32.mrf.mxu0 }
  0x87   :  { %v148_v29 = vmax.f32 %v100_v28, 0.0 }
  0x89   :  { %339 = vmatmul.msk.f32.vlgmr.msra.gmra.mxu1 %vm172_vm1, %v148_v29 }
  0x8c   :  { %v127_v43 = vpop.f32.mrf.mxu3 }
  0x8d   :  { %v157_v48 = vmax.f32 %v127_v43, 0.0 }
  0x8e   :  { %v103_v30 = vpop.f32.mrf.mxu0 }
  0x8f   :  { %v149_v31 = vmax.f32 %v103_v30, 0.0 }
  0x91   :  { %340 = vmatmul.msk.f32.gmra.mxu1 %vm172_vm1, %v149_v31 }
  0x94   :  { %v130_v47 = vpop.f32.mrf.mxu3 }
  0x95   :  { %v158_v50 = vmax.f32 %v130_v47, 0.0 }
  0x96   :  { %v106_v32 = vpop.f32.mrf.mxu0 }
  0x97   :  { %v150_v33 = vmax.f32 %v106_v32, 0.0 }
  0x99   :  { %341 = vmatmul.msk.f32.gmra.mxu1 %vm172_vm1, %v150_v33 }
  0x9c   :  { %v133_v49 = vpop.f32.mrf.mxu3 }
  0x9d   :  { %v159_v52 = vmax.f32 %v133_v49, 0.0 }
  0x9e   :  { %v109_v34 = vpop.f32.mrf.mxu0 }
  0x9f   :  { %v151_v35 = vmax.f32 %v109_v34, 0.0 }
  0xa1   :  { %342 = vmatmul.msk.f32.gmra.mxu1 %vm172_vm1, %v151_v35 }
  0xa4   :  { %v136_v51 = vpop.f32.mrf.mxu3 }
  0xa5   :  { %v160_v53 = vmax.f32 %v136_v51, 0.0 }
  0xa6   :  { %v112_v36 = vpop.f32.mrf.mxu0 }
  0xa7   :  { %v152_v37 = vmax.f32 %v112_v36, 0.0 }
  0xa9   :  { %343 = vmatmul.msk.f32.gmra.mxu1 %vm172_vm1, %v152_v37 }
  0xac   :  { %v139_v54 = vpop.f32.mrf.mxu3 }
  0xad   :  { %v161_v55 = vmax.f32 %v139_v54, 0.0 }
  0xae   :  { %v115_v38 = vpop.f32.mrf.mxu0 }
  0xaf   :  { %v153_v39 = vmax.f32 %v115_v38, 0.0 }
  0xb1   :  { %344 = vmatmul.msk.f32.gmra.mxu1 %vm172_vm1, %v153_v39 }
  0xb4   :  { %v142_v56 = vpop.f32.mrf.mxu3 }
  0xb5   :  { %v162_v57 = vmax.f32 %v142_v56, 0.0 }
  0xb6   :  { %v118_v40 = vpop.f32.mrf.mxu0 }
  0xb7   :  { %v154_v41 = vmax.f32 %v118_v40, 0.0 }
  0xb9   :  { %345 = vmatmul.msk.f32.gmra.mxu1 %vm172_vm1, %v154_v41 }
  0xbc   :  { %v145_v58 = vpop.f32.mrf.mxu3 }
  0xbd   :  { %v163_v59 = vmax.f32 %v145_v58, 0.0 }
  0xbe   :  { %v121_v42 = vpop.f32.mrf.mxu0 }
  0xbf   :  { %v155_v44 = vmax.f32 %v121_v42, 0.0 }
  0xc1   :  { %346 = vmatmul.msk.f32.gmra.mxu1 %vm172_vm1, %v155_v44 }
  0xc6   :  { %v124_v45 = vpop.f32.mrf.mxu0 }
  0xc7   :  { %v156_v46 = vmax.f32 %v124_v45, 0.0 }
  0xc9   :  { %347 = vmatmul.msk.f32.vlgmr.msra.gmra.mxu2 %vm172_vm1, %v156_v46 }
  0xd1   :  { %348 = vmatmul.msk.f32.gmra.mxu2 %vm172_vm1, %v157_v48 }
  0xd9   :  { %349 = vmatmul.msk.f32.gmra.mxu2 %vm172_vm1, %v158_v50 }
  0xe1   :  { %350 = vmatmul.msk.f32.gmra.mxu2 %vm172_vm1, %v159_v52 }
  0xe9   :  { %351 = vmatmul.msk.f32.gmra.mxu2 %vm172_vm1, %v160_v53 }
  0xf1   :  { %352 = vmatmul.msk.f32.gmra.mxu2 %vm172_vm1, %v161_v55 }
  0xf9   :  { %353 = vmatmul.msk.f32.gmra.mxu2 %vm172_vm1, %v162_v57 }
 0x101   :  { %354 = vmatmul.msk.f32.gmra.mxu2 %vm172_vm1, %v163_v59 }
 0x106   :  { %v238_v60 = vpop.f32.mrf.mxu1 }
 0x107   :  { %v286_v61 = vmax.f32 %v238_v60, 0.0 }
 0x109   :  { %303 = vst.msk [vmem:[%s570_s3] sm:$0xff] %vm302_vm2, %v286_v61 }
 0x10e   :  { %v241_v62 = vpop.f32.mrf.mxu1 }
 0x10f   :  { %v287_v63 = vmax.f32 %v241_v62, 0.0 }
 0x111   :  { %304 = vst.msk [vmem:[%s570_s3 + $0x8] sm:$0xff] %vm302_vm2, %v287_v63 }
 0x116   :  { %v244_v0 = vpop.f32.mrf.mxu1 }
 0x117   :  { %v288_v1 = vmax.f32 %v244_v0, 0.0 }
 0x119   :  { %305 = vst.msk [vmem:[%s570_s3 + $0x10] sm:$0xff] %vm302_vm2, %v288_v1 }
 0x11e   :  { %v247_v2 = vpop.f32.mrf.mxu1 }
 0x11f   :  { %v289_v3 = vmax.f32 %v247_v2, 0.0 }
 0x121   :  { %306 = vst.msk [vmem:[%s570_s3 + $0x18] sm:$0xff] %vm302_vm2, %v289_v3 }
 0x126   :  { %v250_v4 = vpop.f32.mrf.mxu1 }
 0x127   :  { %v290_v5 = vmax.f32 %v250_v4, 0.0 }
 0x129   :  { %307 = vst.msk [vmem:[%s570_s3 + $0x20] sm:$0xff] %vm302_vm2, %v290_v5 }
 0x12e   :  { %v253_v6 = vpop.f32.mrf.mxu1 }
 0x12f   :  { %v291_v7 = vmax.f32 %v253_v6, 0.0 }
 0x131   :  { %308 = vst.msk [vmem:[%s570_s3 + $0x28] sm:$0xff] %vm302_vm2, %v291_v7 }
 0x136   :  { %v256_v8 = vpop.f32.mrf.mxu1 }
 0x137   :  { %v292_v9 = vmax.f32 %v256_v8, 0.0 }
 0x139   :  { %309 = vst.msk [vmem:[%s570_s3 + $0x30] sm:$0xff] %vm302_vm2, %v292_v9 }
 0x13e   :  { %v259_v10 = vpop.f32.mrf.mxu1 }
 0x13f   :  { %v293_v11 = vmax.f32 %v259_v10, 0.0 }
 0x141   :  { %310 = vst.msk [vmem:[%s570_s3 + $0x38] sm:$0xff] %vm302_vm2, %v293_v11 }
 0x14c   :  { %v262_v12 = vpop.f32.mrf.mxu2 }
 0x14d   :  { %v294_v13 = vmax.f32 %v262_v12, 0.0 }
 0x14f   :  { %311 = vst.msk [vmem:[%s570_s3 + $0x40] sm:$0xff] %vm302_vm2, %v294_v13 }
 0x154   :  { %v265_v14 = vpop.f32.mrf.mxu2 }
 0x155   :  { %v295_v15 = vmax.f32 %v265_v14, 0.0 }
 0x157   :  { %312 = vst.msk [vmem:[%s570_s3 + $0x48] sm:$0xff] %vm302_vm2, %v295_v15 }
 0x15c   :  { %v268_v16 = vpop.f32.mrf.mxu2 }
 0x15d   :  { %v296_v17 = vmax.f32 %v268_v16, 0.0 }
 0x15f   :  { %313 = vst.msk [vmem:[%s570_s3 + $0x50] sm:$0xff] %vm302_vm2, %v296_v17 }
 0x164   :  { %v271_v18 = vpop.f32.mrf.mxu2 }
 0x165   :  { %v297_v19 = vmax.f32 %v271_v18, 0.0 }
 0x167   :  { %314 = vst.msk [vmem:[%s570_s3 + $0x58] sm:$0xff] %vm302_vm2, %v297_v19 }
 0x16c   :  { %v274_v20 = vpop.f32.mrf.mxu2 }
 0x16d   :  { %v298_v21 = vmax.f32 %v274_v20, 0.0 }
 0x16f   :  { %315 = vst.msk [vmem:[%s570_s3 + $0x60] sm:$0xff] %vm302_vm2, %v298_v21 }
 0x174   :  { %v277_v22 = vpop.f32.mrf.mxu2 }
 0x175   :  { %v299_v23 = vmax.f32 %v277_v22, 0.0 }
 0x177   :  { %316 = vst.msk [vmem:[%s570_s3 + $0x68] sm:$0xff] %vm302_vm2, %v299_v23 }
 0x17c   :  { %v280_v24 = vpop.f32.mrf.mxu2 }
 0x17d   :  { %v300_v25 = vmax.f32 %v280_v24, 0.0 }
 0x17f   :  { %317 = vst.msk [vmem:[%s570_s3 + $0x70] sm:$0xff] %vm302_vm2, %v300_v25 }
 0x184   :  { %v283_v26 = vpop.f32.mrf.mxu2 }
 0x185   :  { %v301_v27 = vmax.f32 %v283_v26, 0.0 }
 0x187   :  { %318 = vst.msk [vmem:[%s570_s3 + $0x78] sm:$0xff] %vm302_vm2, %v301_v27 }

</bundles_post_ra>
